<compile_context>
chip_gen: v7x
topology: tpu7x:2x2x1
jax: 0.10.0
libtpu: 0.0.40
codegen_flags: <defaults>
</compile_context>

<pallas_src>
import functools

import jax
import jax.numpy as jnp
from jax.experimental import pallas as pl
from jax.experimental.pallas import tpu as pltpu

LEAKY_SLOPE = 0.2
BN_EPS = 1e-5


def _detect_vmem_budget():
    """Per-TensorCore VMEM budget for the fused-path threshold / vmem_limit_bytes.

    48 MiB is safe on every generation (v7x has only 64 MiB per core); raise to
    96 MiB when the runtime clearly reports a 128 MiB-class part (v5e / v6e)."""
    budget = 48 * 1024 * 1024
    try:
        cap = int(pltpu.get_tpu_info().vmem_capacity_bytes)
        if cap >= 100 * 1024 * 1024:
            budget = 96 * 1024 * 1024
    except Exception:
        pass
    return budget


_VMEM_BUDGET = _detect_vmem_budget()


def _leaky_relu(x):
    return jnp.where(x > 0, x, LEAKY_SLOPE * x)


def _bn_scale_shift(s, ss, gamma, beta, n):
    """Fold training-mode BN into one scale/shift from batch sum & sum-of-squares.

    TODO(synk): E[x^2]-E[x]^2 can cancel for huge batches with |mean| >> std; the
    fused path uses a centered two-pass variance instead, the tiled path keeps
    this single-pass form to avoid re-reading activations from HBM."""
    inv_n = 1.0 / n
    mean = s * inv_n
    var = jnp.maximum(ss * inv_n - mean * mean, 0.0)
    scale = gamma * jax.lax.rsqrt(var + BN_EPS)
    shift = beta - mean * scale
    return scale, shift


# --------------------------------------------------------------------------
# Fused (single-call) kernel: whole batch resident in VMEM.
# --------------------------------------------------------------------------
def _fused_kernel(z_ref,
                  w1_ref, aux1_ref,
                  w2_ref, aux2_ref,
                  w3_ref, aux3_ref,
                  w4_ref, b4_ref,
                  out_ref):
    inv_n = 1.0 / z_ref.shape[0]
    cdt = w1_ref.dtype  # matmul compute dtype (bf16 or f32)

    def block(x, w_ref, aux_ref):
        aux = aux_ref[...]                              # rows: bias / gamma / beta
        h = jnp.dot(x.astype(cdt), w_ref[...],
                    preferred_element_type=jnp.float32) + aux[0:1, :]
        mean = jnp.sum(h, axis=0, keepdims=True) * inv_n
        c = h - mean                                    # centered two-pass variance
        var = jnp.sum(c * c, axis=0, keepdims=True) * inv_n
        scale = aux[1:2, :] * jax.lax.rsqrt(var + BN_EPS)   # rsqrt -> EUP slot
        return _leaky_relu(c * scale + aux[2:3, :])

    h = block(z_ref[...], w1_ref, aux1_ref)
    h = block(h, w2_ref, aux2_ref)
    h = block(h, w3_ref, aux3_ref)

    # Head Linear(hidden, 1) emitted lane-dense: NT matmul (8,H)x(B,H)->(8,B);
    # row 0 is the real head (rows 1..7 of w4 are zero padding added in the
    # wrapper), so the output is a dense (1, B) lane row -> unmasked stores.
    yh = jax.lax.dot_general(w4_ref[...], h, (((1,), (1,)), ((), ())),
                             preferred_element_type=jnp.float32)
    out_ref[...] = (yh[0:1, :] + b4_ref[...]).astype(out_ref.dtype)


def _fused_forward(z, w1, aux1, w2, aux2, w3, aux3, w4p, b4, budget):
    B = z.shape[0]
    vmem = pl.BlockSpec(memory_space=pltpu.MemorySpace.VMEM)
    args = (z, w1, aux1, w2, aux2, w3, aux3, w4p, b4)
    return pl.pallas_call(
        _fused_kernel,
        out_shape=jax.ShapeDtypeStruct((1, B), jnp.float32),
        in_specs=[vmem] * len(args),
        out_specs=vmem,
        compiler_params=pltpu.CompilerParams(vmem_limit_bytes=budget),
    )(*args)


# --------------------------------------------------------------------------
# Batch-tiled pipeline kernels (fallback for batches that do not fit VMEM).
# --------------------------------------------------------------------------
def _stage_kernel(*refs, apply_prev_bn, batch_size, tile_rows, masked):
    """(optional prev-layer BN + LeakyReLU) -> Linear -> accumulate exact global
    per-feature sum / sum-of-squares across the ("arbitrary") batch-tile grid."""
    if apply_prev_bn:
        stats_p_ref, aux_p_ref, x_ref, w_ref, aux_ref, h_ref, stats_ref = refs
    else:
        x_ref, w_ref, aux_ref, h_ref, stats_ref = refs

    t = pl.program_id(0)

    if apply_prev_bn:
        sp = stats_p_ref[...]
        auxp = aux_p_ref[...]
        scale, shift = _bn_scale_shift(sp[0:1, :], sp[1:2, :],
                                       auxp[1:2, :], auxp[2:3, :], float(batch_size))
        # Elementwise BN/LeakyReLU in f32 (v5e VPU/EUP have no native bf16);
        # bf16 only as MXU operand dtype.
        xm = _leaky_relu(x_ref[...].astype(jnp.float32) * scale + shift).astype(w_ref.dtype)
    else:
        xm = x_ref[...].astype(w_ref.dtype)

    h = jnp.dot(xm, w_ref[...], preferred_element_type=jnp.float32) + aux_ref[0:1, :]
    h_ref[...] = h.astype(h_ref.dtype)     # bf16 intermediate -> halves HBM traffic

    if masked:                             # ragged last tile: drop padded rows
        rows = t * tile_rows + jax.lax.broadcasted_iota(jnp.int32, (tile_rows, 1), 0)
        h = jnp.where(rows < batch_size, h, 0.0)
    s_tile = jnp.sum(h, axis=0, keepdims=True)
    ss_tile = jnp.sum(h * h, axis=0, keepdims=True)

    @pl.when(t == 0)
    def _():
        stats_ref[0:1, :] = s_tile
        stats_ref[1:2, :] = ss_tile

    @pl.when(t != 0)
    def _():
        stats_ref[0:1, :] = stats_ref[0:1, :] + s_tile
        stats_ref[1:2, :] = stats_ref[1:2, :] + ss_tile


def _head_kernel(stats_ref, aux_ref, x_ref, w4_ref, b4_ref, out_ref, *, batch_size):
    """Last BN + LeakyReLU + Linear(hidden, 1) as a VPU multiply + lane reduction."""
    aux = aux_ref[...]
    scale, shift = _bn_scale_shift(stats_ref[0:1, :], stats_ref[1:2, :],
                                   aux[1:2, :], aux[2:3, :], float(batch_size))
    h = _leaky_relu(x_ref[...].astype(jnp.float32) * scale + shift)
    # TODO(synk): emit a lane-dense (1, tb) row (NT matmul) when tb % 128 == 0.
    y = jnp.sum(h * w4_ref[...], axis=-1, keepdims=True) + b4_ref[...]
    out_ref[...] = y.astype(out_ref.dtype)


def _tiled_forward(z_pad, w1, aux1, w2, aux2, w3, aux3, w4, b4, *, true_b, tb, budget):
    b_pad = z_pad.shape[0]
    nt = b_pad // tb
    masked = b_pad != true_b
    idt = z_pad.dtype                      # intermediate dtype == compute dtype

    def tile(f):
        return pl.BlockSpec((tb, f), lambda t: (t, 0))

    def full(a):                           # VMEM-resident across all grid steps
        return pl.BlockSpec(a.shape, lambda t: (0,) * a.ndim)

    # TODO(synk): on v7x, megacore-split the stage grids (outer "parallel" core
    # axis with per-core partial stats rows summed by the consumer) for ~2x on
    # the DMA-bound stages.
    cp_acc = pltpu.CompilerParams(dimension_semantics=("arbitrary",),
                                  vmem_limit_bytes=budget)
    cp_par = pltpu.CompilerParams(dimension_semantics=("parallel",),
                                  vmem_limit_bytes=budget)

    def stage(x, w, aux, prev=None):
        fin, fout = w.shape
        args, specs = [], []
        if prev is not None:
            stats_p, aux_p = prev
            args += [stats_p, aux_p]
            specs += [full(stats_p), full(aux_p)]
        args += [x, w, aux]
        specs += [tile(fin), full(w), full(aux)]
        kern = functools.partial(_stage_kernel, apply_prev_bn=prev is not None,
                                 batch_size=true_b, tile_rows=tb, masked=masked)
        return pl.pallas_call(
            kern,
            grid=(nt,),
            in_specs=specs,
            out_specs=[tile(fout), pl.BlockSpec((2, fout), lambda t: (0, 0))],
            out_shape=[jax.ShapeDtypeStruct((b_pad, fout), idt),
                       jax.ShapeDtypeStruct((2, fout), jnp.float32)],
            compiler_params=cp_acc,
        )(*args)

    h1, s1 = stage(z_pad, w1, aux1)
    h2, s2 = stage(h1, w2, aux2, prev=(s1, aux1))
    # TODO(synk): fuse stage 3 + head (two-phase grid, h3 in persistent VMEM
    # scratch) to drop the h3 HBM round-trip when b_pad*hidden*2 B fits VMEM.
    h3, s3 = stage(h2, w3, aux3, prev=(s2, aux2))

    hdim = w3.shape[1]
    out = pl.pallas_call(
        functools.partial(_head_kernel, batch_size=true_b),
        grid=(nt,),
        in_specs=[full(s3), full(aux3), tile(hdim), full(w4), full(b4)],
        out_specs=pl.BlockSpec((tb, 1), lambda t: (t, 0)),
        out_shape=jax.ShapeDtypeStruct((b_pad, 1), jnp.float32),
        compiler_params=cp_par,
    )(s3, aux3, h3, w4, b4)
    return out[:true_b]


# --------------------------------------------------------------------------
# Public wrapper.
# --------------------------------------------------------------------------
def _fused_fits(batch, latent, hidden, budget):
    # Conservative f32 live-set estimate per batch row inside the fused kernel
    # (input row + several live copies of each hidden-layer activation width),
    # plus slack for weights / aux / padding.
    per_row = 4 * (latent + 16 * hidden)
    return batch * per_row + (2 << 20) <= budget


def _pick_tile(hidden, tile_rows):
    if tile_rows is not None:
        return max(8, (int(tile_rows) // 8) * 8)
    # Target ~6 MiB of per-step activation footprint (double-buffered bf16
    # in/out plus f32 temps) -> multi-thousand-row tiles for small hidden
    # sizes, amortizing the ~0.35us/step pipeline overhead.
    widest = 2 * hidden
    tb = (6 * 1024 * 1024) // max(1, widest * 8)
    return int(max(128, min(4096, (tb // 128) * 128)))


@functools.partial(jax.jit, static_argnames=("tile_rows", "use_bf16", "force_tiled"))
def decoder_loss_forward(z, params, *, tile_rows=None, use_bf16=True, force_tiled=False):
    """Forward pass of Decoder_loss_old (training-mode BatchNorm). Output (B, 1) f32."""
    batch, latent = z.shape
    hidden = params["w1"].shape[1]
    cdt = jnp.bfloat16 if use_bf16 else jnp.float32

    z_c = z.astype(cdt)
    w1 = params["w1"].astype(cdt)
    w2 = params["w2"].astype(cdt)
    w3 = params["w3"].astype(cdt)
    aux1, aux2, aux3 = params["aux1"], params["aux2"], params["aux3"]
    w4, b4 = params["w4"], params["b4"]          # head stays f32

    budget = _VMEM_BUDGET

    if (not force_tiled) and _fused_fits(batch, latent, hidden, budget):
        w4p = jnp.pad(w4, ((0, 7), (0, 0)))      # sublane-pad head row for NT matmul
        out_row = _fused_forward(z_c, w1, aux1, w2, aux2, w3, aux3, w4p, b4, budget)
        return out_row.reshape(batch, 1)

    # Batch-tiled pipeline; ragged batches are zero-padded and masked (exact BN).
    tb = _pick_tile(hidden, tile_rows)
    nt = -(-batch // tb)
    b_pad = nt * tb
    z_pad = z_c if b_pad == batch else jnp.pad(z_c, ((0, b_pad - batch), (0, 0)))
    return _tiled_forward(z_pad, w1, aux1, w2, aux2, w3, aux3, w4, b4,
                          true_b=batch, tb=tb, budget=budget)


def init_params(key, latent_dim, hidden_dim):
    """PyTorch-default init. Linear weights stored (in, out); per-layer
    (bias, gamma, beta) packed into a single (3, out) slab; head as a (1, H) row."""
    dims = [
        (latent_dim, hidden_dim),
        (hidden_dim, hidden_dim * 2),
        (hidden_dim * 2, hidden_dim),
        (hidden_dim, 1),
    ]
    keys = jax.random.split(key, 2 * len(dims))
    ws, bs = [], []
    for i, (din, dout) in enumerate(dims):
        bound = float(din) ** -0.5
        ws.append(jax.random.uniform(keys[2 * i], (din, dout), jnp.float32, -bound, bound))
        bs.append(jax.random.uniform(keys[2 * i + 1], (1, dout), jnp.float32, -bound, bound))

    params = {}
    for i in range(3):
        dout = dims[i][1]
        params[f"w{i + 1}"] = ws[i]
        params[f"aux{i + 1}"] = jnp.concatenate(
            [bs[i], jnp.ones((1, dout), jnp.float32), jnp.zeros((1, dout), jnp.float32)],
            axis=0)
    params["w4"] = ws[3].T          # (1, hidden)
    params["b4"] = bs[3]            # (1, 1)
    return params


def _reference_forward(z, params):
    """Pure-JAX f32 reference (training-mode BN, biased variance)."""
    h = z
    for i in range(1, 4):
        w = params[f"w{i}"]
        aux = params[f"aux{i}"]
        h = h @ w + aux[0:1]
        mean = jnp.mean(h, axis=0, keepdims=True)
        var = jnp.mean((h - mean) ** 2, axis=0, keepdims=True)
        h = (h - mean) * jax.lax.rsqrt(var + BN_EPS) * aux[1:2] + aux[2:3]
        h = jnp.where(h > 0, h, LEAKY_SLOPE * h)
    return h @ params["w4"].T + params["b4"]


if __name__ == "__main__":
    latent_dim, hidden_dim = 16, 32
    key = jax.random.PRNGKey(0)
    k_params, k_z1, k_z2 = jax.random.split(key, 3)
    params = init_params(k_params, latent_dim, hidden_dim)

    # 1) Small batch -> fused single-call path (f32 exact-structure check + bf16 run).
    z_small = jax.random.normal(k_z1, (8, latent_dim), jnp.float32)
    ref_small = _reference_forward(z_small, params)
    out_f32 = decoder_loss_forward(z_small, params, use_bf16=False)
    out_bf16 = decoder_loss_forward(z_small, params)
    jax.block_until_ready((out_f32, out_bf16))
    assert out_bf16.shape == (8, 1) and out_bf16.dtype == jnp.float32
    assert bool(jnp.allclose(out_f32, ref_small, rtol=1e-3, atol=1e-3)), (
        float(jnp.max(jnp.abs(out_f32 - ref_small))))
    assert bool(jnp.allclose(out_bf16, ref_small, rtol=1e-1, atol=1e-1)), (
        float(jnp.max(jnp.abs(out_bf16 - ref_small))))

    # 2) Ragged batch (600 rows, 128-row tiles -> 5 tiles, last one masked) through
    #    the batch-tiled pipeline; cross-check against the reference and fused path.
    z_big = jax.random.normal(k_z2, (600, latent_dim), jnp.float32)
    ref_big = _reference_forward(z_big, params)
    out_t_f32 = decoder_loss_forward(z_big, params, use_bf16=False,
                                     force_tiled=True, tile_rows=128)
    out_t_bf16 = decoder_loss_forward(z_big, params, force_tiled=True, tile_rows=128)
    out_fused = decoder_loss_forward(z_big, params)          # fused path, bf16
    jax.block_until_ready((out_t_f32, out_t_bf16, out_fused))
    assert out_t_f32.shape == (600, 1)
    assert bool(jnp.allclose(out_t_f32, ref_big, rtol=1e-3, atol=1e-3)), (
        float(jnp.max(jnp.abs(out_t_f32 - ref_big))))
    assert bool(jnp.allclose(out_t_bf16, out_fused, rtol=1e-1, atol=1e-1)), (
        float(jnp.max(jnp.abs(out_t_bf16 - out_fused))))

    print("KERNEL_OK")
</pallas_src>

<mosaic_0001>
module attributes {stable_mosaic.version = 11 : i64} {
  func.func @_fused_kernel(%arg0: memref<8x16xf32, #tpu.memory_space<vmem>>, %arg1: memref<16x32xf32, #tpu.memory_space<vmem>>, %arg2: memref<3x32xf32, #tpu.memory_space<vmem>>, %arg3: memref<32x64xf32, #tpu.memory_space<vmem>>, %arg4: memref<3x64xf32, #tpu.memory_space<vmem>>, %arg5: memref<64x32xf32, #tpu.memory_space<vmem>>, %arg6: memref<3x32xf32, #tpu.memory_space<vmem>>, %arg7: memref<8x32xf32, #tpu.memory_space<vmem>>, %arg8: memref<1x1xf32, #tpu.memory_space<vmem>>, %arg9: memref<1x8xf32, #tpu.memory_space<vmem>>) attributes {dimension_semantics = [], scalar_prefetch = 0 : i64, scratch_operands = 0 : i64, tpu.core_type = #tpu.core_type<tc>} {
    %c0 = arith.constant 0 : index
    %c0_0 = arith.constant 0 : index
    %0 = vector.load %arg0[%c0, %c0_0] : memref<8x16xf32, #tpu.memory_space<vmem>>, vector<8x16xf32>
    %c0_1 = arith.constant 0 : index
    %c0_2 = arith.constant 0 : index
    %1 = vector.load %arg2[%c0_1, %c0_2] : memref<3x32xf32, #tpu.memory_space<vmem>>, vector<3x32xf32>
    %c0_3 = arith.constant 0 : index
    %c0_4 = arith.constant 0 : index
    %2 = vector.load %arg1[%c0_3, %c0_4] : memref<16x32xf32, #tpu.memory_space<vmem>>, vector<16x32xf32>
    %cst = arith.constant dense<0.000000e+00> : vector<8x32xf32>
    %3 = tpu.matmul %0, %2, %cst {dimension_numbers = #tpu.dot_dimension_numbers<[1], [0], [0], [1], [0, 0, 1, 1], [], []>} : vector<8x16xf32>, vector<16x32xf32>, vector<8x32xf32> -> vector<8x32xf32>
    %4 = vector.extract_strided_slice %1 {offsets = [0, 0], sizes = [1, 32], strides = [1, 1]} : vector<3x32xf32> to vector<1x32xf32>
    %5 = vector.broadcast %4 : vector<1x32xf32> to vector<8x32xf32>
    %6 = arith.addf %3, %5 : vector<8x32xf32>
    %cst_5 = arith.constant dense<0.000000e+00> : vector<32xf32>
    %7 = vector.multi_reduction <add>, %6, %cst_5 [0] : vector<8x32xf32> to vector<32xf32>
    %8 = vector.shape_cast %7 : vector<32xf32> to vector<1x32xf32>
    %cst_6 = arith.constant 1.250000e-01 : f32
    %9 = vector.broadcast %cst_6 : f32 to vector<1x32xf32>
    %10 = arith.mulf %8, %9 : vector<1x32xf32>
    %11 = vector.broadcast %10 : vector<1x32xf32> to vector<8x32xf32>
    %12 = arith.subf %6, %11 : vector<8x32xf32>
    %13 = arith.mulf %12, %12 : vector<8x32xf32>
    %cst_7 = arith.constant dense<0.000000e+00> : vector<32xf32>
    %14 = vector.multi_reduction <add>, %13, %cst_7 [0] : vector<8x32xf32> to vector<32xf32>
    %15 = vector.shape_cast %14 : vector<32xf32> to vector<1x32xf32>
    %cst_8 = arith.constant 1.250000e-01 : f32
    %16 = vector.broadcast %cst_8 : f32 to vector<1x32xf32>
    %17 = arith.mulf %15, %16 : vector<1x32xf32>
    %18 = vector.extract_strided_slice %1 {offsets = [1, 0], sizes = [1, 32], strides = [1, 1]} : vector<3x32xf32> to vector<1x32xf32>
    %cst_9 = arith.constant 9.99999974E-6 : f32
    %19 = vector.broadcast %cst_9 : f32 to vector<1x32xf32>
    %20 = arith.addf %17, %19 : vector<1x32xf32>
    %21 = math.rsqrt %20 : vector<1x32xf32>
    %22 = arith.mulf %18, %21 : vector<1x32xf32>
    %23 = vector.broadcast %22 : vector<1x32xf32> to vector<8x32xf32>
    %24 = arith.mulf %12, %23 : vector<8x32xf32>
    %25 = vector.extract_strided_slice %1 {offsets = [2, 0], sizes = [1, 32], strides = [1, 1]} : vector<3x32xf32> to vector<1x32xf32>
    %26 = vector.broadcast %25 : vector<1x32xf32> to vector<8x32xf32>
    %27 = arith.addf %24, %26 : vector<8x32xf32>
    %cst_10 = arith.constant 0.000000e+00 : f32
    %28 = vector.broadcast %cst_10 : f32 to vector<8x32xf32>
    %29 = arith.cmpf ogt, %27, %28 : vector<8x32xf32>
    %cst_11 = arith.constant 2.000000e-01 : f32
    %30 = vector.broadcast %cst_11 : f32 to vector<8x32xf32>
    %31 = arith.mulf %30, %27 : vector<8x32xf32>
    %32 = arith.select %29, %27, %31 : vector<8x32xi1>, vector<8x32xf32>
    %c0_12 = arith.constant 0 : index
    %c0_13 = arith.constant 0 : index
    %33 = vector.load %arg4[%c0_12, %c0_13] : memref<3x64xf32, #tpu.memory_space<vmem>>, vector<3x64xf32>
    %c0_14 = arith.constant 0 : index
    %c0_15 = arith.constant 0 : index
    %34 = vector.load %arg3[%c0_14, %c0_15] : memref<32x64xf32, #tpu.memory_space<vmem>>, vector<32x64xf32>
    %cst_16 = arith.constant dense<0.000000e+00> : vector<8x64xf32>
    %35 = tpu.matmul %32, %34, %cst_16 {dimension_numbers = #tpu.dot_dimension_numbers<[1], [0], [0], [1], [0, 0, 1, 1], [], []>} : vector<8x32xf32>, vector<32x64xf32>, vector<8x64xf32> -> vector<8x64xf32>
    %36 = vector.extract_strided_slice %33 {offsets = [0, 0], sizes = [1, 64], strides = [1, 1]} : vector<3x64xf32> to vector<1x64xf32>
    %37 = vector.broadcast %36 : vector<1x64xf32> to vector<8x64xf32>
    %38 = arith.addf %35, %37 : vector<8x64xf32>
    %cst_17 = arith.constant dense<0.000000e+00> : vector<64xf32>
    %39 = vector.multi_reduction <add>, %38, %cst_17 [0] : vector<8x64xf32> to vector<64xf32>
    %40 = vector.shape_cast %39 : vector<64xf32> to vector<1x64xf32>
    %cst_18 = arith.constant 1.250000e-01 : f32
    %41 = vector.broadcast %cst_18 : f32 to vector<1x64xf32>
    %42 = arith.mulf %40, %41 : vector<1x64xf32>
    %43 = vector.broadcast %42 : vector<1x64xf32> to vector<8x64xf32>
    %44 = arith.subf %38, %43 : vector<8x64xf32>
    %45 = arith.mulf %44, %44 : vector<8x64xf32>
    %cst_19 = arith.constant dense<0.000000e+00> : vector<64xf32>
    %46 = vector.multi_reduction <add>, %45, %cst_19 [0] : vector<8x64xf32> to vector<64xf32>
    %47 = vector.shape_cast %46 : vector<64xf32> to vector<1x64xf32>
    %cst_20 = arith.constant 1.250000e-01 : f32
    %48 = vector.broadcast %cst_20 : f32 to vector<1x64xf32>
    %49 = arith.mulf %47, %48 : vector<1x64xf32>
    %50 = vector.extract_strided_slice %33 {offsets = [1, 0], sizes = [1, 64], strides = [1, 1]} : vector<3x64xf32> to vector<1x64xf32>
    %cst_21 = arith.constant 9.99999974E-6 : f32
    %51 = vector.broadcast %cst_21 : f32 to vector<1x64xf32>
    %52 = arith.addf %49, %51 : vector<1x64xf32>
    %53 = math.rsqrt %52 : vector<1x64xf32>
    %54 = arith.mulf %50, %53 : vector<1x64xf32>
    %55 = vector.broadcast %54 : vector<1x64xf32> to vector<8x64xf32>
    %56 = arith.mulf %44, %55 : vector<8x64xf32>
    %57 = vector.extract_strided_slice %33 {offsets = [2, 0], sizes = [1, 64], strides = [1, 1]} : vector<3x64xf32> to vector<1x64xf32>
    %58 = vector.broadcast %57 : vector<1x64xf32> to vector<8x64xf32>
    %59 = arith.addf %56, %58 : vector<8x64xf32>
    %cst_22 = arith.constant 0.000000e+00 : f32
    %60 = vector.broadcast %cst_22 : f32 to vector<8x64xf32>
    %61 = arith.cmpf ogt, %59, %60 : vector<8x64xf32>
    %cst_23 = arith.constant 2.000000e-01 : f32
    %62 = vector.broadcast %cst_23 : f32 to vector<8x64xf32>
    %63 = arith.mulf %62, %59 : vector<8x64xf32>
    %64 = arith.select %61, %59, %63 : vector<8x64xi1>, vector<8x64xf32>
    %c0_24 = arith.constant 0 : index
    %c0_25 = arith.constant 0 : index
    %65 = vector.load %arg6[%c0_24, %c0_25] : memref<3x32xf32, #tpu.memory_space<vmem>>, vector<3x32xf32>
    %c0_26 = arith.constant 0 : index
    %c0_27 = arith.constant 0 : index
    %66 = vector.load %arg5[%c0_26, %c0_27] : memref<64x32xf32, #tpu.memory_space<vmem>>, vector<64x32xf32>
    %cst_28 = arith.constant dense<0.000000e+00> : vector<8x32xf32>
    %67 = tpu.matmul %64, %66, %cst_28 {dimension_numbers = #tpu.dot_dimension_numbers<[1], [0], [0], [1], [0, 0, 1, 1], [], []>} : vector<8x64xf32>, vector<64x32xf32>, vector<8x32xf32> -> vector<8x32xf32>
    %68 = vector.extract_strided_slice %65 {offsets = [0, 0], sizes = [1, 32], strides = [1, 1]} : vector<3x32xf32> to vector<1x32xf32>
    %69 = vector.broadcast %68 : vector<1x32xf32> to vector<8x32xf32>
    %70 = arith.addf %67, %69 : vector<8x32xf32>
    %cst_29 = arith.constant dense<0.000000e+00> : vector<32xf32>
    %71 = vector.multi_reduction <add>, %70, %cst_29 [0] : vector<8x32xf32> to vector<32xf32>
    %72 = vector.shape_cast %71 : vector<32xf32> to vector<1x32xf32>
    %cst_30 = arith.constant 1.250000e-01 : f32
    %73 = vector.broadcast %cst_30 : f32 to vector<1x32xf32>
    %74 = arith.mulf %72, %73 : vector<1x32xf32>
    %75 = vector.broadcast %74 : vector<1x32xf32> to vector<8x32xf32>
    %76 = arith.subf %70, %75 : vector<8x32xf32>
    %77 = arith.mulf %76, %76 : vector<8x32xf32>
    %cst_31 = arith.constant dense<0.000000e+00> : vector<32xf32>
    %78 = vector.multi_reduction <add>, %77, %cst_31 [0] : vector<8x32xf32> to vector<32xf32>
    %79 = vector.shape_cast %78 : vector<32xf32> to vector<1x32xf32>
    %cst_32 = arith.constant 1.250000e-01 : f32
    %80 = vector.broadcast %cst_32 : f32 to vector<1x32xf32>
    %81 = arith.mulf %79, %80 : vector<1x32xf32>
    %82 = vector.extract_strided_slice %65 {offsets = [1, 0], sizes = [1, 32], strides = [1, 1]} : vector<3x32xf32> to vector<1x32xf32>
    %cst_33 = arith.constant 9.99999974E-6 : f32
    %83 = vector.broadcast %cst_33 : f32 to vector<1x32xf32>
    %84 = arith.addf %81, %83 : vector<1x32xf32>
    %85 = math.rsqrt %84 : vector<1x32xf32>
    %86 = arith.mulf %82, %85 : vector<1x32xf32>
    %87 = vector.broadcast %86 : vector<1x32xf32> to vector<8x32xf32>
    %88 = arith.mulf %76, %87 : vector<8x32xf32>
    %89 = vector.extract_strided_slice %65 {offsets = [2, 0], sizes = [1, 32], strides = [1, 1]} : vector<3x32xf32> to vector<1x32xf32>
    %90 = vector.broadcast %89 : vector<1x32xf32> to vector<8x32xf32>
    %91 = arith.addf %88, %90 : vector<8x32xf32>
    %cst_34 = arith.constant 0.000000e+00 : f32
    %92 = vector.broadcast %cst_34 : f32 to vector<8x32xf32>
    %93 = arith.cmpf ogt, %91, %92 : vector<8x32xf32>
    %cst_35 = arith.constant 2.000000e-01 : f32
    %94 = vector.broadcast %cst_35 : f32 to vector<8x32xf32>
    %95 = arith.mulf %94, %91 : vector<8x32xf32>
    %96 = arith.select %93, %91, %95 : vector<8x32xi1>, vector<8x32xf32>
    %c0_36 = arith.constant 0 : index
    %c0_37 = arith.constant 0 : index
    %97 = vector.load %arg7[%c0_36, %c0_37] : memref<8x32xf32, #tpu.memory_space<vmem>>, vector<8x32xf32>
    %cst_38 = arith.constant dense<0.000000e+00> : vector<8x8xf32>
    %98 = tpu.matmul %97, %96, %cst_38 {dimension_numbers = #tpu.dot_dimension_numbers<[1], [1], [0], [0], [0, 0, 1, 0], [], []>} : vector<8x32xf32>, vector<8x32xf32>, vector<8x8xf32> -> vector<8x8xf32>
    %99 = vector.extract_strided_slice %98 {offsets = [0, 0], sizes = [1, 8], strides = [1, 1]} : vector<8x8xf32> to vector<1x8xf32>
    %c0_39 = arith.constant 0 : index
    %c0_40 = arith.constant 0 : index
    %100 = vector.load %arg8[%c0_39, %c0_40] : memref<1x1xf32, #tpu.memory_space<vmem>>, vector<1x1xf32>
    %101 = vector.broadcast %100 : vector<1x1xf32> to vector<1x8xf32>
    %102 = arith.addf %99, %101 : vector<1x8xf32>
    %c0_41 = arith.constant 0 : index
    %c0_42 = arith.constant 0 : index
    %103 = vector.load %arg9[%c0_41, %c0_42] : memref<1x8xf32, #tpu.memory_space<vmem>>, vector<1x8xf32>
    tpu.vector_store %arg9[%c0_41, %c0_42], %102 {strides = array<i32>} : memref<1x8xf32, #tpu.memory_space<vmem>>, vector<1x8xf32>,
    return
  }
}

</mosaic_0001>

<bundles_post_ra>
// kernel: decoder_loss_forward.1
= control target key start
LH: loop header
LB: loop body
LE: loop exit
PB: predicated region body
PF: predicated region fallthrough
CT: control target
= control target key end

     0   :  { %s780_s0 = inlined_call_operand.vmem [shape: f32[8,16], index: 0, kind: input, shape index: {}]   ;;  %s781_s1 = inlined_call_operand.vmem [shape: f32[16,32], index: 1, kind: input, shape index: {}]   ;;  %s782_s2 = inlined_call_operand.vmem [shape: f32[3,32], index: 2, kind: input, shape index: {}]   ;;  %s783_s3 = inlined_call_operand.vmem [shape: f32[32,64], index: 3, kind: input, shape index: {}]   ;;  %s784_s4 = inlined_call_operand.vmem [shape: f32[3,64], index: 4, kind: input, shape index: {}]   ;;  %s785_s5 = inlined_call_operand.vmem [shape: f32[64,32], index: 5, kind: input, shape index: {}]   ;;  %s786_s6 = inlined_call_operand.vmem [shape: f32[3,32], index: 6, kind: input, shape index: {}]   ;;  %s787_s7 = inlined_call_operand.vmem [shape: f32[8,32], index: 7, kind: input, shape index: {}]   ;;  %s788_s8 = inlined_call_operand.<no memory space> [shape: f32[1,1], index: 8, kind: input, shape index: {}]   ;;  %s789_s9 = inlined_call_operand.hbm [shape: f32[1,8], index: 9, kind: output, shape index: {}]  }
   0x1   :  { %v14_v0 = vstv %s788_s8 }
   0x2   :  { %15 = vst [vmem:[#allocation2] sm:$0x1] %v14_v0 }
   0x3   :  { %v37_v1 = vld [vmem:[%s781_s1] sm:$0xff]  ;;  %v38_v2 = vld [vmem:[%s781_s1 + $0x8] sm:$0xff]  ;;  %v616_v3 = vmov 0.0|0.0   ;;  %vm617_vm0 = vmmov 0   ;;  %v618_v5 = vmov 0.0  }
   0x4   :  { %559 = vmatprep.subr.bf16.mxu1 %v616_v3  ;;  %v560_v4 = vpack.c.bf16 %v38_v2, %v37_v1  ;;  %521 = vmatprep.mubr.msk.f32.mxu1 %vm617_vm0, %v618_v5 }
   0x5   :  { %16 = vsyncpa [#allocation4], 0  ;;  %568 = vmatprep.subr.bf16.mxu0 %v616_v3  ;;  %551 = vmatprep.mubr.msk.f32.mxu0 %vm617_vm0, %v618_v5  ;;  %v35_v6 = vld [vmem:[%s780_s0] sm:$0xff]  ;;  %vm43_vm1 = vcmask 130048   ;;  %v154_v8 = vld [vmem:[%s783_s3 + $0x8] sm:$0xff]  ;;  %v39_v13 = vlaneseq  ;;  %vm117_vm2 = vcmask 261120  }
   0x6   :  { %561 = vmatpush3.bf16.msra.mxu1 %v560_v4  ;;  %v153_v7 = vld [vmem:[%s783_s3] sm:$0xff]  ;;  %v155_v10 = vld [vmem:[%s783_s3 + $0x10] sm:$0xff]  ;;  %v156_v11 = vld [vmem:[%s783_s3 + $0x18] sm:$0xff]  ;;  %vm234_vm4 = vcmask 523264   ;;  %s620_s18 = smov [#allocation3]   ;;  %vm477_vm7 = vcmask 57344  }
   0x7   :  { %562 = vmatprep.subr.bf16.mxu1 %v616_v3  ;;  %v563_v9 = vpack.c.bf16 %v154_v8, %v153_v7  ;;  %v566_v12 = vpack.c.bf16 %v156_v11, %v155_v10  ;;  %v40_v14 = vshrl.u32 %v39_v13, 7  ;;  %v36_v16 = vld [vmem:[%s782_s2] sm:$0x7]  ;;  %v271_v51 = vld [vmem:[%s785_s5 + $0x8] sm:$0xff]  ;;  %v272_v53 = vld [vmem:[%s785_s5 + $0x10] sm:$0xff]  ;;  %s485_s19 = sshll.u32 %s620_s18, 4  ;;  %s486_s19 = int_to_ptr.vmem [resolvable:$true] %s485_s19 }
   0x8   :  { %v270_v50 = vld [vmem:[%s785_s5] sm:$0xff]  ;;  %v273_v54 = vld [vmem:[%s785_s5 + $0x18] sm:$0xff]  ;;  %v275_v57 = vld [vmem:[%s785_s5 + $0x28] sm:$0xff]  ;;  %s592_s0 = scalar_lea.vmem %s486_s19, 16  ;;  %s596_s20 = scalar_lea.vmem %s486_s19, 32 }
   0x9   :  { %522 = vmatmul.mubr.msk.f32.vlgmr.msra.gmra.mrb[0].mxu1 %vm43_vm1, %v35_v6  ;;  %v702_v15 = vsub.s32 0, %v40_v14  ;;  %v710_v40 = vsub.s32 1, %v40_v14  ;;  %v712_v41 = vsub.s32 2, %v40_v14  ;;  %v569_v52 = vpack.c.bf16 %v271_v51, %v270_v50  ;;  %v274_v56 = vld [vmem:[%s785_s5 + $0x20] sm:$0xff]  ;;  %v276_v59 = vld [vmem:[%s785_s5 + $0x30] sm:$0xff]  ;;  %v277_v60 = vld [vmem:[%s785_s5 + $0x38] sm:$0xff]  ;;  %p593_p0 = scmp.ne.s32.totalorder %s486_s19, %s592_s0  ;;  %p597_p1 = scmp.lt.s32.totalorder %s486_s19, %s486_s19 }
   0xa   :  { %532 = vmatprep.mubr.msk.f32.mxu1 %vm617_vm0, %v618_v5  ;;  %564 = vmatpush3.bf16.msra.mxu1 %v563_v9  ;;  %v572_v55 = vpack.c.bf16 %v273_v54, %v272_v53  ;;  %v575_v58 = vpack.c.bf16 %v275_v57, %v274_v56  ;;  %v578_v61 = vpack.c.bf16 %v277_v60, %v276_v59  ;;  %v152_v62 = vld [vmem:[%s784_s4] sm:$0x7]  ;;  %p598_p2 = scmp.lt.s32.totalorder %s596_s20, %s592_s0 }
   0xb   :  { %565 = vmatprep.subr.bf16.mxu1 %v616_v3  ;;  %v42_v17 = vrot.slane %v36_v16, %v702_v15  ;;  %v147_v45 = vrot.slane %v36_v16, %v712_v41  ;;  %570 = vmatpush3.bf16.msra.mxu0 %v569_v52  ;;  %v160_v63 = vrot.slane %v152_v62, %v702_v15 }
   0xc   :  { %571 = vmatprep.subr.bf16.mxu0 %v616_v3  ;;  %p599_p3 = por %p598_p2, %p597_p1 }
   0xe   :  { %567 = vmatpush3.bf16.msra.mxu1 %v566_v12  ;;  %p600_p4 = pnand %p599_p3, %p593_p0 }
   0xf   :  { %554 = vmatprep.subr.mxu1 %v618_v5  ;;  %573 = vmatpush3.bf16.msra.mxu0 %v572_v55 }
  0x10   :  { %574 = vmatprep.subr.bf16.mxu0 %v616_v3 }
  0x13   :  { %576 = vmatpush3.bf16.msra.mxu0 %v575_v58 }
  0x14   :  { %577 = vmatprep.subr.bf16.mxu0 %v616_v3 }
  0x17   :  { %579 = vmatpush3.bf16.msra.mxu0 %v578_v61 }
  0xdc   :  { %v113_v18 = vpop.f32.mrb[0].mxu1 }
  0xdd   :  { %v114_v19 = vadd.f32 %v113_v18, %v42_v17  ;;  %v523_v20 = vpop.f32.mrb[1].mxu1 }
  0xdf   :  { %v118_v21 = vsel %vm117_vm2, %v114_v19, 0.0 }
  0xe0   :  { %v119_v22 = vrot.slane %v118_v21, 4 }
  0xe2   :  { %v120_v23 = vadd.f32 %v119_v22, %v118_v21 }
  0xe4   :  { %v121_v24 = vrot.slane %v120_v23, 2 }
  0xe6   :  { %v122_v25 = vadd.f32 %v121_v24, %v120_v23 }
  0xe8   :  { %v123_v26 = vrot.slane %v122_v25, 1 }
  0xea   :  { %v124_v27 = vadd.f32 %v123_v26, %v122_v25  ;;  %v264_v26 = vrot.slane %v152_v62, %v712_v41 }
  0xec   :  { %v125_v28 = vmul.f32 0.125, %v124_v27 }
  0xee   :  { %v126_v29 = vsub.f32 %v114_v19, %v125_v28 }
  0xf0   :  { %v127_v30 = vmul.f32 %v126_v29, %v126_v29 }
  0xf2   :  { %v128_v31 = vsel %vm117_vm2, %v127_v30, 0.0 }
  0xf3   :  { %v129_v32 = vrot.slane %v128_v31, 4 }
  0xf5   :  { %v130_v33 = vadd.f32 %v129_v32, %v128_v31  ;;  %v466_v31 = vld [vmem:[#allocation2] sm:$0x1]  ;;  %v619_v32 = vmov 0  }
  0xf6   :  { %585 = vset.pattern.permute.xlu0 %v619_v32 }
  0xf7   :  { %v131_v34 = vrot.slane %v130_v33, 2  ;;  %469 = vperm.xlu0 %585, %v466_v31  }
  0xf9   :  { %v132_v35 = vadd.f32 %v131_v34, %v130_v33  ;;  %v269_v33 = vld [vmem:[%s786_s6] sm:$0x7] }
  0xfa   :  { %v281_v34 = vrot.slane %v269_v33, %v702_v15 }
  0xfb   :  { %v133_v36 = vrot.slane %v132_v35, 1 }
  0xfd   :  { %v134_v37 = vadd.f32 %v133_v36, %v132_v35 }
  0xff   :  { %v135_v38 = vmul.f32 0.125, %v134_v37 }
 0x101   :  { %v136_v39 = vadd.f32 1e-05, %v135_v38 }
 0x103   :  { %586 = vrsqrt.f32 %v136_v39 }
 0x10d   :  { %v587_v42 = vpop.eup %586 }
 0x10e   :  { %v138_v43 = vmul.f32 %v587_v42, %v36_v16 }
 0x110   :  { %v142_v44 = vrot.slane %v138_v43, %v710_v40 }
 0x112   :  { %v143_v46 = vmul.f32 %v142_v44, %v126_v29 }
 0x114   :  { %v148_v47 = vadd.f32 %v147_v45, %v143_v46 }
 0x116   :  { %vm149_vm3 = vcmp.gt.f32.partialorder %v148_v47, 0.0  ;;  %v150_v48 = vmul.f32 0.2, %v148_v47 }
 0x118   :  { %v151_v49 = vsel %vm149_vm3, %v148_v47, %v150_v48 }
 0x119   :  { %533 = vmatmul.mubr.msk.f32.vlgmr.msra.gmra.mrb[2].mxu1 %vm117_vm2, %v151_v49 }
 0x11a   :  { %556 = vmatprep.mubr.msk.f32.mxu1 %vm617_vm0, %v618_v5 }
 0x1ec   :  { %v230_v0 = vpop.f32.mrb[2].mxu1 }
 0x1ed   :  { %v231_v1 = vadd.f32 %v230_v0, %v160_v63  ;;  %v534_v2 = vpop.f32.mrb[3].mxu1 }
 0x1ef   :  { %v235_v3 = vsel %vm234_vm4, %v231_v1, 0.0 }
 0x1f0   :  { %v236_v4 = vrot.slane %v235_v3, 4 }
 0x1f2   :  { %v237_v5 = vadd.f32 %v236_v4, %v235_v3  ;;  %v389_v3 = vld [vmem:[%s787_s7] sm:$0xff]  ;;  %v470_v4 = vpop.permute.xlu0 %469 }
 0x1f4   :  { %v238_v6 = vrot.slane %v237_v5, 2 }
 0x1f6   :  { %v239_v7 = vadd.f32 %v238_v6, %v237_v5  ;;  %v475_v5 = vrot.slane %v470_v4, %v702_v15 }
 0x1f8   :  { %v240_v8 = vrot.slane %v239_v7, 1 }
 0x1fa   :  { %v241_v9 = vadd.f32 %v240_v8, %v239_v7 }
 0x1fc   :  { %v242_v10 = vmul.f32 0.125, %v241_v9 }
 0x1fe   :  { %v243_v11 = vsub.f32 %v231_v1, %v242_v10 }
 0x200   :  { %v244_v12 = vmul.f32 %v243_v11, %v243_v11 }
 0x202   :  { %v245_v13 = vsel %vm234_vm4, %v244_v12, 0.0 }
 0x203   :  { %v246_v14 = vrot.slane %v245_v13, 4 }
 0x205   :  { %v247_v16 = vadd.f32 %v246_v14, %v245_v13 }
 0x207   :  { %v248_v17 = vrot.slane %v247_v16, 2 }
 0x209   :  { %v249_v18 = vadd.f32 %v248_v17, %v247_v16 }
 0x20b   :  { %v250_v19 = vrot.slane %v249_v18, 1 }
 0x20d   :  { %v251_v20 = vadd.f32 %v250_v19, %v249_v18 }
 0x20f   :  { %v252_v21 = vmul.f32 0.125, %v251_v20 }
 0x211   :  { %v253_v22 = vadd.f32 1e-05, %v252_v21 }
 0x213   :  { %588 = vrsqrt.f32 %v253_v22 }
 0x21d   :  { %v589_v23 = vpop.eup %588 }
 0x21e   :  { %v255_v24 = vmul.f32 %v589_v23, %v152_v62  ;;  %v384_v62 = vrot.slane %v269_v33, %v712_v41 }
 0x220   :  { %v259_v25 = vrot.slane %v255_v24, %v710_v40 }
 0x222   :  { %v260_v27 = vmul.f32 %v259_v25, %v243_v11 }
 0x224   :  { %v265_v28 = vadd.f32 %v264_v26, %v260_v27 }
 0x226   :  { %vm266_vm5 = vcmp.gt.f32.partialorder %v265_v28, 0.0  ;;  %v267_v29 = vmul.f32 0.2, %v265_v28 }
 0x228   :  { %v268_v30 = vsel %vm266_vm5, %v265_v28, %v267_v29 }
 0x229   :  { %552 = vmatmul.mubr.msk.f32.vlgmr.msra.gmra.mrb[0].mxu0 %vm234_vm4, %v268_v30 }
 0x2fc   :  { %v351_v35 = vpop.f32.mrb[0].mxu0 }
 0x2fd   :  { %v352_v36 = vadd.f32 %v351_v35, %v281_v34  ;;  %v553_v37 = vpop.f32.mrb[1].mxu0 }
 0x2ff   :  { %v355_v38 = vsel %vm117_vm2, %v352_v36, 0.0 }
 0x300   :  { %v356_v39 = vrot.slane %v355_v38, 4 }
 0x302   :  { %v357_v42 = vadd.f32 %v356_v39, %v355_v38 }
 0x304   :  { %v358_v43 = vrot.slane %v357_v42, 2 }
 0x306   :  { %v359_v44 = vadd.f32 %v358_v43, %v357_v42 }
 0x308   :  { %v360_v45 = vrot.slane %v359_v44, 1 }
 0x30a   :  { %v361_v46 = vadd.f32 %v360_v45, %v359_v44 }
 0x30c   :  { %v362_v47 = vmul.f32 0.125, %v361_v46 }
 0x30e   :  { %v363_v48 = vsub.f32 %v352_v36, %v362_v47 }
 0x310   :  { %v364_v49 = vmul.f32 %v363_v48, %v363_v48 }
 0x312   :  { %v365_v50 = vsel %vm117_vm2, %v364_v49, 0.0 }
 0x313   :  { %v366_v51 = vrot.slane %v365_v50, 4 }
 0x315   :  { %v367_v52 = vadd.f32 %v366_v51, %v365_v50 }
 0x317   :  { %v368_v53 = vrot.slane %v367_v52, 2 }
 0x319   :  { %v369_v54 = vadd.f32 %v368_v53, %v367_v52 }
 0x31b   :  { %v370_v55 = vrot.slane %v369_v54, 1 }
 0x31d   :  { %v371_v56 = vadd.f32 %v370_v55, %v369_v54 }
 0x31f   :  { %v372_v57 = vmul.f32 0.125, %v371_v56 }
 0x321   :  { %v373_v58 = vadd.f32 1e-05, %v372_v57 }
 0x323   :  { %590 = vrsqrt.f32 %v373_v58 }
 0x32d   :  { %v591_v59 = vpop.eup %590 }
 0x32e   :  { %v375_v60 = vmul.f32 %v591_v59, %v269_v33 }
 0x330   :  { %v379_v61 = vrot.slane %v375_v60, %v710_v40 }
 0x332   :  { %v380_v63 = vmul.f32 %v379_v61, %v363_v48 }
 0x334   :  { %v385_v0 = vadd.f32 %v384_v62, %v380_v63 }
 0x336   :  { %vm386_vm6 = vcmp.gt.f32.partialorder %v385_v0, 0.0  ;;  %v387_v1 = vmul.f32 0.2, %v385_v0 }
 0x338   :  { %v388_v2 = vsel %vm386_vm6, %v385_v0, %v387_v1 }
 0x339   :  { %555 = vmatpush3.xpose.msk.msra.mxu1 %vm117_vm2, %v388_v2 }
 0x33c   :  { %557 = vmatmul.mubr.msk.f32.vlgmr.msra.gmra.mrb[4].mxu1 %vm117_vm2, %v389_v3 }
 0x40f   :  { %v462_v40 = vpop.f32.mrb[4].mxu1 }
 0x410   :  { %v476_v41 = vadd.f32 %v475_v5, %v462_v40  ;;  %v558_v6 = vpop.f32.mrb[5].mxu1 }
 0x412   :  { %478 = vst.msk [vmem:[#allocation3] sm:$0x1] %vm477_vm7, %v476_v41 }
 0x413   :  { %603 = shalt.err (!%p600_p4)
}
 0x414   :  { %s604_s22 = scalar_lea.hbm %s789_s9, 16 }
 0x415   :  { %p605_p5 = scmp.ne.s32.totalorder %s789_s9, %s604_s22  ;;  %p608_p6 = scmp.lt.u32.totalorder %s604_s22, %s789_s9 }
 0x417   :  { %p610_p7 = pnand %p608_p6, %p605_p5 }
 0x419   :  { %613 = shalt.err (!%p610_p7)
}
 0x41a   :  { %488 = dma.vmem_to_hbm [thread:$0]  %s486_s19, 16, %s789_s9, [#allocation4]  }
 0x41b   :  { %614 = dma.done.wait [#allocation4], 16  }
 0x41c   :  { %615 = vsyncadd [#allocation4], 4294967280 }
 0x41d   :  { %492 = vsyncpa [#allocation4], 1 }

</bundles_post_ra>
